<compile_context>
chip_gen: v7x
topology: tpu7x:2x2x1
jax: 0.10.0
libtpu: 0.0.40
codegen_flags: <defaults>
</compile_context>

<pallas_src>
import functools

import jax
import jax.numpy as jnp
from jax.experimental import pallas as pl
from jax.experimental.pallas import tpu as pltpu

LANE = 128        # TPU lane width; output last dim padded to a multiple of this.
TN_WIDE = 256     # column-tile width when tiling is needed (fills v6e/v7x 256-wide MXU)
TN_SINGLE_MAX = 512  # up to this padded width, use one gridless block


def fused_logsoftmax_kernel(x_ref, w_ref, o_ref):
    # x: (B, D_in)   w: (D_in, tn)   o: (B, tn) = log_softmax over axis 0 of x @ w
    # (fc1/fc2 biases cancel under log_softmax(dim=0); W is the pre-folded W1^T @ W2^T)
    z = jnp.dot(x_ref[...], w_ref[...], preferred_element_type=jnp.float32)

    # Numerically stable log-softmax along dim=0 (batch rows).  The whole batch lives
    # in this block and the reduction is per-column, so it never crosses grid steps.
    m = jnp.max(z, axis=0, keepdims=True)
    lse = m + jnp.log(jnp.sum(jnp.exp(z - m), axis=0, keepdims=True))
    o_ref[...] = (z - lse).astype(o_ref.dtype)


def prepare_params(w1, b1, w2, b2):
    """One-time parameter prep (outside the per-call hot path).

    torch.nn.Linear stores weights as (out, in).  Since log_softmax(dim=0) cancels any
    per-column constant, both bias terms drop out, and the two linears fold into a
    single matmul:  W_fused = W1^T @ W2^T  with shape (D_in, tagset), zero-padded along
    the output dim to a multiple of 128 so the kernel's output is lane-dense.
    """
    del b1, b2  # per-column constants -> cancel exactly under log_softmax(dim=0)

    w1_t = jnp.asarray(w1, jnp.float32).T            # (D_in, H)
    w2_t = jnp.asarray(w2, jnp.float32).T            # (H, tagset)
    w_fused = w1_t @ w2_t                            # (D_in, tagset)

    tagset = w2.shape[0]
    d_in = w1.shape[1]
    t_pad = max(LANE, ((tagset + LANE - 1) // LANE) * LANE)

    w_pad = jnp.zeros((d_in, t_pad), jnp.float32).at[:, :tagset].set(w_fused)
    return w_pad, tagset


@functools.partial(jax.jit, static_argnums=(2,))
def mlp_logsoftmax(x, w_fused, tagset):
    """x: (B, D_in) f32; w_fused: (D_in, T_pad) pre-folded/padded by prepare_params."""
    B, d_in = x.shape
    t_pad = w_fused.shape[1]

    cost = pl.CostEstimate(
        flops=2 * B * d_in * t_pad,
        transcendentals=B * t_pad + t_pad,                       # exp per element + log per col
        bytes_accessed=4 * (B * d_in + d_in * t_pad + B * t_pad),
    )

    if t_pad <= TN_SINGLE_MAX:
        # Default / small tagset: one lane-dense block, no grid, no pipeline machinery.
        out_padded = pl.pallas_call(
            fused_logsoftmax_kernel,
            out_shape=jax.ShapeDtypeStruct((B, t_pad), jnp.float32),
            in_specs=[
                pl.BlockSpec((B, d_in), lambda: (0, 0)),
                pl.BlockSpec((d_in, t_pad), lambda: (0, 0)),
            ],
            out_specs=pl.BlockSpec((B, t_pad), lambda: (0, 0)),
            cost_estimate=cost,
        )(x, w_fused)
    else:
        # Large tagset: tile columns (256-wide fills v6e/v7x MXU; per-column softmax
        # means no cross-tile reduction) and mark parallel for v7x megacore sharding.
        tn = TN_WIDE
        grid = (t_pad // tn,)
        out_padded = pl.pallas_call(
            fused_logsoftmax_kernel,
            out_shape=jax.ShapeDtypeStruct((B, t_pad), jnp.float32),
            grid=grid,
            in_specs=[
                pl.BlockSpec((B, d_in), lambda j: (0, 0)),     # x (whole batch)
                pl.BlockSpec((d_in, tn), lambda j: (0, j)),    # W_fused column tile
            ],
            out_specs=pl.BlockSpec((B, tn), lambda j: (0, j)),  # lane-dense output tile
            compiler_params=pltpu.CompilerParams(
                dimension_semantics=("parallel",),
            ),
            cost_estimate=cost,
        )(x, w_fused)

    # Drop the lane padding once, outside the kernel.
    return out_padded[:, :tagset]


def reference(x, w1, b1, w2, b2):
    h = x @ w1.T + b1
    z = h @ w2.T + b2
    return jax.nn.log_softmax(z, axis=0)


if __name__ == "__main__":
    # Small shapes consistent with the module: batch=8, input_size=32, hidden=32, tagset=16
    B, D_IN, HID, TAG = 8, 32, 32, 16

    key = jax.random.PRNGKey(0)
    kx, kw1, kb1, kw2, kb2 = jax.random.split(key, 5)

    x = jax.random.normal(kx, (B, D_IN), dtype=jnp.float32)
    # Deterministic parameter init (uniform, similar scale to torch's default Linear init).
    w1 = jax.random.uniform(kw1, (HID, D_IN), jnp.float32, -1.0 / (D_IN ** 0.5), 1.0 / (D_IN ** 0.5))
    b1 = jax.random.uniform(kb1, (HID,), jnp.float32, -1.0 / (D_IN ** 0.5), 1.0 / (D_IN ** 0.5))
    w2 = jax.random.uniform(kw2, (TAG, HID), jnp.float32, -1.0 / (HID ** 0.5), 1.0 / (HID ** 0.5))
    b2 = jax.random.uniform(kb2, (TAG,), jnp.float32, -1.0 / (HID ** 0.5), 1.0 / (HID ** 0.5))

    # One-time parameter preparation (fold + pad), kept out of the per-call hot path.
    w_fused, tagset = prepare_params(w1, b1, w2, b2)

    out = mlp_logsoftmax(x, w_fused, tagset)
    out = jax.block_until_ready(out)

    ref = reference(x, w1, b1, w2, b2)
    assert out.shape == (B, TAG), out.shape
    assert jnp.allclose(out, ref, atol=1e-5, rtol=1e-5), float(jnp.max(jnp.abs(out - ref)))

    print("KERNEL_OK")
</pallas_src>

<mosaic_0001>
module attributes {stable_mosaic.version = 11 : i64} {
  func.func @fused_logsoftmax_kernel(%arg0: memref<8x32xf32, #tpu.memory_space<vmem>>, %arg1: memref<32x128xf32, #tpu.memory_space<vmem>>, %arg2: memref<8x128xf32, #tpu.memory_space<vmem>>) attributes {dimension_semantics = [], scalar_prefetch = 0 : i64, scratch_operands = 0 : i64, tpu.core_type = #tpu.core_type<tc>} {
    %c0 = arith.constant 0 : index
    %c0_0 = arith.constant 0 : index
    %0 = vector.load %arg0[%c0, %c0_0] : memref<8x32xf32, #tpu.memory_space<vmem>>, vector<8x32xf32>
    %c0_1 = arith.constant 0 : index
    %c0_2 = arith.constant 0 : index
    %1 = vector.load %arg1[%c0_1, %c0_2] : memref<32x128xf32, #tpu.memory_space<vmem>>, vector<32x128xf32>
    %cst = arith.constant dense<0.000000e+00> : vector<8x128xf32>
    %2 = tpu.matmul %0, %1, %cst {dimension_numbers = #tpu.dot_dimension_numbers<[1], [0], [0], [1], [0, 0, 1, 1], [], []>} : vector<8x32xf32>, vector<32x128xf32>, vector<8x128xf32> -> vector<8x128xf32>
    %cst_3 = arith.constant dense<0xFF800000> : vector<128xf32>
    %3 = vector.multi_reduction <maximumf>, %2, %cst_3 [0] : vector<8x128xf32> to vector<128xf32>
    %4 = vector.shape_cast %3 : vector<128xf32> to vector<1x128xf32>
    %5 = vector.broadcast %4 : vector<1x128xf32> to vector<8x128xf32>
    %6 = arith.subf %2, %5 : vector<8x128xf32>
    %7 = math.exp %6 : vector<8x128xf32>
    %cst_4 = arith.constant dense<0.000000e+00> : vector<128xf32>
    %8 = vector.multi_reduction <add>, %7, %cst_4 [0] : vector<8x128xf32> to vector<128xf32>
    %9 = vector.shape_cast %8 : vector<128xf32> to vector<1x128xf32>
    %10 = math.log %9 : vector<1x128xf32>
    %11 = arith.addf %4, %10 : vector<1x128xf32>
    %12 = vector.broadcast %11 : vector<1x128xf32> to vector<8x128xf32>
    %13 = arith.subf %2, %12 : vector<8x128xf32>
    %c0_5 = arith.constant 0 : index
    %c0_6 = arith.constant 0 : index
    %14 = vector.load %arg2[%c0_5, %c0_6] : memref<8x128xf32, #tpu.memory_space<vmem>>, vector<8x128xf32>
    tpu.vector_store %arg2[%c0_5, %c0_6], %13 {strides = array<i32>} : memref<8x128xf32, #tpu.memory_space<vmem>>, vector<8x128xf32>,
    return
  }
}

</mosaic_0001>

<bundles_post_ra>
// kernel: mlp_logsoftmax.1
= control target key start
LH: loop header
LB: loop body
LE: loop exit
PB: predicated region body
PF: predicated region fallthrough
CT: control target
= control target key end

     0   :  { %7 = vsyncpa [#allocation3], 0  ;;  %s326_s0 = inlined_call_operand.hbm [shape: f32[8,32], index: 0, kind: input, shape index: {}]   ;;  %s327_s1 = inlined_call_operand.hbm [shape: f32[32,128], index: 1, kind: input, shape index: {}]   ;;  %s328_s2 = inlined_call_operand.hbm [shape: f32[8,128], index: 2, kind: output, shape index: {}]  }
   0x1   :  { %8 = vsyncpa [#allocation6], 0 }
   0x2   :  { %9 = vsyncpa [#allocation4], 0  ;;  %s260_s9 = smov [#allocation2]   ;;  %s261_s11 = smov [#allocation5]  }
   0x3   :  { %s16_s10 = sshll.u32 %s260_s9, 4  ;;  %s25_s12 = sshll.u32 %s261_s11, 4  ;;  %s17_s10 = int_to_ptr.vmem [resolvable:$true] %s16_s10  ;;  %s283_s12 = int_to_ptr.vmem [resolvable:$true] %s25_s12 }
   0x4   :  { %s188_s15 = scalar_lea.hbm %s326_s0, 128 }
   0x5   :  { %p189_p0 = scmp.ne.s32.totalorder %s326_s0, %s188_s15  ;;  %p192_p1 = scmp.lt.u32.totalorder %s188_s15, %s326_s0 }
   0x7   :  { %p194_p2 = pnand %p192_p1, %p189_p0 }
   0x9   :  { %197 = shalt.err (!%p194_p2)
}
   0xa   :  { %s198_s20 = scalar_lea.vmem %s17_s10, 128  ;;  %p203_p4 = scmp.lt.s32.totalorder %s17_s10, %s17_s10 }
   0xb   :  { %p199_p3 = scmp.ne.s32.totalorder %s17_s10, %s198_s20  ;;  %p204_p5 = scmp.lt.s32.totalorder %s198_s20, %s198_s20 }
   0xd   :  { %p205_p6 = por %p204_p5, %p203_p4 }
   0xf   :  { %p206_p7 = pnand %p205_p6, %p199_p3 }
  0x11   :  { %209 = shalt.err (!%p206_p7)
}
  0x12   :  { %19 = dma.hbm_to_vmem [thread:$0]  %s326_s0, 128, %s17_s10, [#allocation3]  }
  0x13   :  { %s210_s25 = scalar_lea.hbm %s327_s1, 512 }
  0x14   :  { %p211_p8 = scmp.ne.s32.totalorder %s327_s1, %s210_s25  ;;  %p214_p9 = scmp.lt.u32.totalorder %s210_s25, %s327_s1 }
  0x16   :  { %p216_p10 = pnand %p214_p9, %p211_p8 }
  0x18   :  { %219 = shalt.err (!%p216_p10)
}
  0x19   :  { %s220_s30 = scalar_lea.vmem %s283_s12, 512  ;;  %p225_p12 = scmp.lt.s32.totalorder %s283_s12, %s283_s12 }
  0x1a   :  { %p221_p11 = scmp.ne.s32.totalorder %s283_s12, %s220_s30  ;;  %p226_p13 = scmp.lt.s32.totalorder %s220_s30, %s220_s30 }
  0x1c   :  { %p227_p0 = por %p226_p13, %p225_p12 }
  0x1e   :  { %p228_p1 = pnand %p227_p0, %p221_p11 }
  0x20   :  { %231 = shalt.err (!%p228_p1)
}
  0x21   :  { %s262_s0 = smov 128   ;;  %s263_s3 = smov 8  }
  0x22   :  { %31 = dma.hbm_to_vmem [thread:$0]  %s327_s1, 512, %s283_s12, [#allocation6], %s262_s0, %s262_s0, %s263_s3  }
  0x23   :  { %254 = dma.done.wait [#allocation3], 128  }
  0x24   :  { %255 = vsyncadd [#allocation3], 4294967168 }
  0x25   :  { %256 = dma.done.wait [#allocation6], 512  }
  0x26   :  { %257 = vsyncadd [#allocation6], 4294966784  ;;  %v264_v0 = vmov 0.0|0.0   ;;  %vm265_vm0 = vmmov 0   ;;  %v266_v1 = vmov 0.0   ;;  %v39_v2 = vld [vmem:[#allocation5] sm:$0xff] }
  0x27   :  { %170 = vmatprep.subr.bf16.mxu0 %v264_v0  ;;  %167 = vmatprep.mubr.msk.f32.mxu0 %vm265_vm0, %v266_v1  ;;  %v40_v3 = vld [vmem:[#allocation5 + $0x8] sm:$0xff]  ;;  %v41_v4 = vld [vmem:[#allocation5 + $0x10] sm:$0xff]  ;;  %v42_v6 = vld [vmem:[#allocation5 + $0x18] sm:$0xff]  ;;  %vm43_vm1 = vcmask 261120   ;;  %s267_s1 = smov [#allocation7]  }
  0x28   :  { %v171_v5 = vpack.c.bf16 %v40_v3, %v39_v2  ;;  %v174_v7 = vpack.c.bf16 %v42_v6, %v41_v4  ;;  %v38_v8 = vld [vmem:[#allocation2] sm:$0xff]  ;;  %s143_s6 = sshll.u32 %s267_s1, 4  ;;  %s144_s6 = int_to_ptr.vmem [resolvable:$true] %s143_s6 }
  0x29   :  { %s232_s7 = scalar_lea.vmem %s144_s6, 128  ;;  %p237_p3 = scmp.lt.s32.totalorder %s144_s6, %s144_s6 }
  0x2a   :  { %172 = vmatpush3.bf16.msra.mxu0 %v171_v5  ;;  %p233_p2 = scmp.ne.s32.totalorder %s144_s6, %s232_s7  ;;  %p238_p4 = scmp.lt.s32.totalorder %s232_s7, %s232_s7 }
  0x2b   :  { %173 = vmatprep.subr.bf16.mxu0 %v264_v0 }
  0x2c   :  { %p239_p5 = por %p238_p4, %p237_p3 }
  0x2e   :  { %175 = vmatpush3.bf16.msra.mxu0 %v174_v7  ;;  %p240_p6 = pnand %p239_p5, %p233_p2 }
  0x31   :  { %168 = vmatmul.mubr.msk.f32.vlgmr.msra.gmra.mrb[0].mxu0 %vm43_vm1, %v38_v8 }
 0x104   :  { %v113_v9 = vpop.f32.mrb[0].mxu0 }
 0x105   :  { %v117_v10 = vrot.slane %v113_v9, 4  ;;  %v169_v11 = vpop.f32.mrb[1].mxu0 }
 0x107   :  { %v118_v12 = vmax.f32 %v113_v9, %v117_v10 }
 0x109   :  { %v119_v13 = vrot.slane %v118_v12, 2 }
 0x10b   :  { %v120_v14 = vmax.f32 %v118_v12, %v119_v13 }
 0x10d   :  { %v121_v15 = vrot.slane %v120_v14, 1 }
 0x10f   :  { %v122_v16 = vmax.f32 %v120_v14, %v121_v15 }
 0x111   :  { %v123_v17 = vsub.f32 %v113_v9, %v122_v16 }
 0x113   :  { %v124_v18 = vmul.f32 1.442695, %v123_v17 }
 0x115   :  { %184 = vpow2.f32 %v124_v18 }
 0x11f   :  { %v185_v19 = vpop.eup %184 }
 0x120   :  { %v126_v20 = vrot.slane %v185_v19, 4 }
 0x122   :  { %v127_v21 = vadd.f32 %v185_v19, %v126_v20 }
 0x124   :  { %v128_v22 = vrot.slane %v127_v21, 2 }
 0x126   :  { %v129_v23 = vadd.f32 %v128_v22, %v127_v21 }
 0x128   :  { %v130_v24 = vrot.slane %v129_v23, 1 }
 0x12a   :  { %v131_v25 = vadd.f32 %v130_v24, %v129_v23 }
 0x12c   :  { %186 = vlog2.f32 %v131_v25 }
 0x136   :  { %v187_v26 = vpop.eup %186 }
 0x137   :  { %v133_v27 = vmul.f32 0.6931472, %v187_v26 }
 0x139   :  { %v134_v28 = vadd.f32 %v133_v27, %v122_v16 }
 0x13b   :  { %v135_v29 = vsub.f32 %v113_v9, %v134_v28 }
 0x13d   :  { %136 = vst [vmem:[#allocation7] sm:$0xff] %v135_v29 }
 0x13e   :  { %243 = shalt.err (!%p240_p6)
}
 0x13f   :  { %s244_s10 = scalar_lea.hbm %s328_s2, 128 }
 0x140   :  { %p245_p7 = scmp.ne.s32.totalorder %s328_s2, %s244_s10  ;;  %p248_p8 = scmp.lt.u32.totalorder %s244_s10, %s328_s2 }
 0x142   :  { %p250_p9 = pnand %p248_p8, %p245_p7 }
 0x144   :  { %253 = shalt.err (!%p250_p9)
}
 0x145   :  { %146 = dma.vmem_to_hbm [thread:$0]  %s144_s6, 128, %s328_s2, [#allocation4]  }
 0x146   :  { %258 = dma.done.wait [#allocation4], 128  }
 0x147   :  { %259 = vsyncadd [#allocation4], 4294967168 }
 0x148   :  { %150 = vsyncpa [#allocation3], 1 }
 0x149   :  { %151 = vsyncpa [#allocation6], 1 }
 0x14a   :  { %152 = vsyncpa [#allocation4], 1 }

</bundles_post_ra>
